<compile_context>
chip_gen: v6e
topology: v6e:2x2x1
jax: 0.10.0
libtpu: 0.0.40
codegen_flags: <defaults>
</compile_context>

<pallas_src>
import functools

import jax
import jax.numpy as jnp
from jax import lax
from jax.experimental import pallas as pl
from jax.experimental.pallas import tpu as pltpu


def conv_stats_kernel(x_ref, w_ref, y_ref, stat_ref, *, B, H):
    """3x3 SAME conv via block-Toeplitz weights + one-pass BN partials.

    x_ref:    (B, H, W*Cin)       bf16  NHWC with W,Cin fused on lanes (no pad)
    w_ref:    (3, W*Cin, W*Cout)  bf16  per-kernel-row block-Toeplitz weights
                                        (width zero-padding folded in)
    y_ref:    (B, H, W*Cout)      bf16  raw conv output, lane-dense
    stat_ref: (1, 2, W*Cout)      f32   per-step [sum ; sum of squares]
    """
    w_top, w_mid, w_bot = w_ref[0], w_ref[1], w_ref[2]
    row = lax.broadcasted_iota(jnp.int32, (H, 1), 0)

    wcout = y_ref.shape[-1]
    s = jnp.zeros((1, wcout), jnp.float32)
    sq = jnp.zeros((1, wcout), jnp.float32)

    for b in range(B):                                   # static unroll, B small
        x = x_ref[b]                                     # (H, W*Cin) bf16
        # One MXU matmul per kernel row: K = W*Cin, Nout = W*Cout (lane-dense).
        q_mid = jnp.dot(x, w_mid, preferred_element_type=jnp.float32)
        q_top = jnp.dot(x, w_top, preferred_element_type=jnp.float32)
        q_bot = jnp.dot(x, w_bot, preferred_element_type=jnp.float32)
        # Height zero-padding folded in here: output row h needs input rows
        # h-1 / h / h+1 -> sublane roll (XLU) + boundary-row mask (VPU).
        acc = q_mid
        acc = acc + jnp.where(row > 0,
                              pltpu.roll(q_top, shift=1, axis=0), 0.0)
        acc = acc + jnp.where(row < H - 1,
                              pltpu.roll(q_bot, shift=H - 1, axis=0), 0.0)

        y_ref[b] = acc.astype(y_ref.dtype)               # bf16 intermediate
        s = s + jnp.sum(acc, axis=0, keepdims=True)      # f32 one-pass partials
        sq = sq + jnp.sum(acc * acc, axis=0, keepdims=True)

    stat_ref[0] = jnp.concatenate([s, sq], axis=0)       # (2, W*Cout)


def norm_lrelu_kernel(y_ref, scale_ref, shift_ref, o_ref):
    # y_ref: (TM, W*Cout) bf16 ; scale/shift: (1, W*Cout) f32 ; o_ref: f32.
    y = y_ref[...].astype(jnp.float32) * scale_ref[...] + shift_ref[...]
    o_ref[...] = jnp.maximum(y, 0.01 * y)                # LeakyReLU(0.01)


def _pick_image_block(n_images, per_image_bytes, budget=4 << 20):
    """Images per phase-1 step: fatten steps but keep >=2 parallel steps."""
    if n_images < 2:
        return 1
    for cand in (8, 4, 2):
        if (n_images % cand == 0 and n_images // cand >= 2
                and cand * per_image_bytes <= budget):
            return cand
    return 1


@jax.jit
def conv_block_forward(x_nchw, w_oihw, b, gamma, beta):
    """Forward pass of conv_block. x_nchw: (N, Cin, H, W) float32, NCHW."""
    del b  # conv bias is exactly cancelled by training-mode BN mean subtraction
    N, Cin, H, W = x_nchw.shape
    Cout = w_oihw.shape[0]
    eps = 1e-5
    WCin, WCout = W * Cin, W * Cout

    # ---- layout glue (module boundary is NCHW) -----------------------------
    # TODO(synk): accept/emit NHWC at the framework boundary to drop the two
    # full-array transposes (pure HBM traffic for this mem-bound fused op).
    x_fused = jnp.transpose(x_nchw, (0, 2, 3, 1)).reshape(N, H, WCin)
    x_fused = x_fused.astype(jnp.bfloat16)

    # Block-Toeplitz weights:
    #   BigW[dy][(w+dx-1)*Cin+ci, w*Cout+co] = W[co, ci, dy, dx]
    # with out-of-range columns dropped -> width zero-padding folded in.
    w_dxy = jnp.transpose(w_oihw, (2, 3, 1, 0))           # (3, 3, Cin, Cout)
    bigw = jnp.stack([
        sum(jnp.kron(jnp.eye(W, W, k=1 - dx, dtype=w_dxy.dtype), w_dxy[dy, dx])
            for dx in range(3))
        for dy in range(3)
    ]).astype(jnp.bfloat16)                               # (3, W*Cin, W*Cout)

    # ---- phase 1: conv + per-step BN partial stats --------------------------
    per_img = H * (WCin * 2 + WCout * 2 + 3 * WCout * 4)  # x + y + f32 temps
    B_blk = _pick_image_block(N, per_img)
    n_steps = N // B_blk
    # TODO(synk): for very large H*W add a row-block grid axis with a 1-row
    # halo (pl.Element offsets or manual DMA) and re-budget for v7x's 64 MiB.
    kern = functools.partial(conv_stats_kernel, B=B_blk, H=H)
    y_conv, pstats = pl.pallas_call(
        kern,
        out_shape=(
            jax.ShapeDtypeStruct((N, H, WCout), jnp.bfloat16),
            jax.ShapeDtypeStruct((n_steps, 2, WCout), jnp.float32),
        ),
        grid=(n_steps,),
        in_specs=[
            pl.BlockSpec((B_blk, H, WCin), lambda n: (n, 0, 0)),
            pl.BlockSpec((3, WCin, WCout), lambda n: (0, 0, 0)),
        ],
        out_specs=(
            pl.BlockSpec((B_blk, H, WCout), lambda n: (n, 0, 0)),
            pl.BlockSpec((1, 2, WCout), lambda n: (n, 0, 0)),
        ),
        compiler_params=pltpu.CompilerParams(
            dimension_semantics=("parallel",),
            vmem_limit_bytes=32 * 1024 * 1024),
    )(x_fused, bigw)

    # ---- fold BN into one per-channel scale/shift (tiny, plain JAX) ---------
    # TODO(synk): E[x^2]-E[x]^2 in f32 can cancel for huge N*H*W or large
    # per-channel means; switch to centered per-step partials at prod scale.
    totals = jnp.sum(pstats, axis=0).reshape(2, W, Cout).sum(axis=1)  # (2,Cout)
    count = N * H * W
    mean = totals[0] / count
    var = totals[1] / count - mean * mean
    scale = gamma * lax.rsqrt(var + eps)                  # (Cout,)
    shift = beta - mean * scale                           # (Cout,)
    scale_row = jnp.tile(scale, W).reshape(1, WCout)
    shift_row = jnp.tile(shift, W).reshape(1, WCout)

    # ---- phase 2: normalize + affine + LeakyReLU (lane-dense, tiled) --------
    rows = N * H
    TM = min(512, rows)
    if rows > 8:                   # >=2 row blocks so both v7x TCs get work
        TM = min(TM, pl.cdiv(rows, 2))
        TM = max(8, (TM // 8) * 8)
    y_flat = y_conv.reshape(rows, WCout)
    out_flat = pl.pallas_call(
        norm_lrelu_kernel,
        out_shape=jax.ShapeDtypeStruct((rows, WCout), jnp.float32),
        grid=(pl.cdiv(rows, TM),),
        in_specs=[
            pl.BlockSpec((TM, WCout), lambda i: (i, 0)),
            pl.BlockSpec((1, WCout), lambda i: (0, 0)),
            pl.BlockSpec((1, WCout), lambda i: (0, 0)),
        ],
        out_specs=pl.BlockSpec((TM, WCout), lambda i: (i, 0)),
        compiler_params=pltpu.CompilerParams(
            dimension_semantics=("parallel",),
            vmem_limit_bytes=32 * 1024 * 1024),
    )(y_flat, scale_row, shift_row)

    out_nhwc = out_flat.reshape(N, H, W, Cout)
    return jnp.transpose(out_nhwc, (0, 3, 1, 2))          # back to NCHW


def reference_forward(x_nchw, w_oihw, b, gamma, beta):
    """Pure-JAX reference of the module's forward.

    Conv inputs are rounded to bf16 (mirroring the kernel's bf16 MXU path);
    accumulation, the intermediate and BN statistics stay f32.  The reference
    keeps the conv bias — training-mode BN cancels it exactly, which is why
    the kernel drops it.
    """
    x_nhwc = jnp.transpose(x_nchw, (0, 2, 3, 1)).astype(jnp.bfloat16)
    w_hwio = jnp.transpose(w_oihw, (2, 3, 1, 0)).astype(jnp.bfloat16)
    y = lax.conv_general_dilated(
        x_nhwc, w_hwio, window_strides=(1, 1), padding="SAME",
        dimension_numbers=("NHWC", "HWIO", "NHWC"),
        preferred_element_type=jnp.float32,
    ) + b.reshape(1, 1, 1, -1)
    mean = jnp.mean(y, axis=(0, 1, 2), keepdims=True)
    var = jnp.mean((y - mean) ** 2, axis=(0, 1, 2), keepdims=True)
    y = (y - mean) * lax.rsqrt(var + 1e-5)
    y = y * gamma.reshape(1, 1, 1, -1) + beta.reshape(1, 1, 1, -1)
    y = jnp.where(y >= 0, y, 0.01 * y)
    return jnp.transpose(y, (0, 3, 1, 2))


if __name__ == "__main__":
    # Small shapes consistent with the module: N=2, Cin=4, H=W=16, Cout=8.
    N, Cin, H, W, Cout = 2, 4, 16, 16, 8

    key = jax.random.PRNGKey(0)
    kx, kw, kb = jax.random.split(key, 3)

    x = jax.random.normal(kx, (N, Cin, H, W), dtype=jnp.float32)

    # Parameter init mirroring nn.Conv2d / nn.BatchNorm2d + xavier(gain=sqrt(2)).
    fan_in, fan_out = Cin * 9, Cout * 9
    limit = jnp.sqrt(2.0) * jnp.sqrt(6.0 / (fan_in + fan_out))
    w = jax.random.uniform(kw, (Cout, Cin, 3, 3), jnp.float32, -limit, limit)
    b_bound = 1.0 / jnp.sqrt(fan_in)
    b = jax.random.uniform(kb, (Cout,), jnp.float32, -b_bound, b_bound)
    gamma = jnp.ones((Cout,), jnp.float32)   # BatchNorm2d default weight
    beta = jnp.zeros((Cout,), jnp.float32)   # BatchNorm2d default bias

    out = jax.block_until_ready(conv_block_forward(x, w, b, gamma, beta))
    ref = jax.block_until_ready(reference_forward(x, w, b, gamma, beta))

    assert out.shape == (N, Cout, H, W), out.shape
    # bf16 MXU inputs + the deliberate bf16 conv intermediate bound the error
    # at ~2^-9 relative to the pre-BN activation; 5e-3 covers that with margin.
    assert jnp.allclose(out, ref, atol=5e-3, rtol=5e-3), (
        float(jnp.max(jnp.abs(out - ref)))
    )

    print("KERNEL_OK")
</pallas_src>

<mosaic_0001>
module attributes {stable_mosaic.version = 11 : i64} {
  func.func @conv_stats_kernel(%arg0: i32, %arg1: memref<1x16x64xbf16, #tpu.memory_space<vmem>>, %arg2: memref<3x64x128xbf16, #tpu.memory_space<vmem>>, %arg3: memref<1x16x128xbf16, #tpu.memory_space<vmem>>, %arg4: memref<1x2x128xf32, #tpu.memory_space<vmem>>) attributes {dimension_semantics = [#tpu.dimension_semantics<parallel>], iteration_bounds = array<i64: 2>, scalar_prefetch = 0 : i64, scratch_operands = 0 : i64, tpu.core_type = #tpu.core_type<tc>, window_params = [{transform_indices = @transform_0, window_bounds = array<i64: 1, 16, 64>}, {pipeline_mode = #tpu.pipeline_mode<synchronous>, transform_indices = @transform_1, window_bounds = array<i64: 3, 64, 128>}, {transform_indices = @transform_2, window_bounds = array<i64: 1, 16, 128>}, {transform_indices = @transform_3, window_bounds = array<i64: 1, 2, 128>}]} {
    %c0 = arith.constant 0 : index
    %c0_0 = arith.constant 0 : index
    %c0_1 = arith.constant 0 : index
    %0 = vector.load %arg2[%c0, %c0_0, %c0_1] : memref<3x64x128xbf16, #tpu.memory_space<vmem>>, vector<1x64x128xbf16>
    %1 = vector.shape_cast %0 : vector<1x64x128xbf16> to vector<64x128xbf16>
    %c1 = arith.constant 1 : index
    %c0_2 = arith.constant 0 : index
    %c0_3 = arith.constant 0 : index
    %2 = vector.load %arg2[%c1, %c0_2, %c0_3] : memref<3x64x128xbf16, #tpu.memory_space<vmem>>, vector<1x64x128xbf16>
    %3 = vector.shape_cast %2 : vector<1x64x128xbf16> to vector<64x128xbf16>
    %c2 = arith.constant 2 : index
    %c0_4 = arith.constant 0 : index
    %c0_5 = arith.constant 0 : index
    %4 = vector.load %arg2[%c2, %c0_4, %c0_5] : memref<3x64x128xbf16, #tpu.memory_space<vmem>>, vector<1x64x128xbf16>
    %5 = vector.shape_cast %4 : vector<1x64x128xbf16> to vector<64x128xbf16>
    %6 = tpu.iota {dimensions = array<i32: 0>} : vector<16x1xi32>
    %cst = arith.constant 0.000000e+00 : f32
    %7 = vector.broadcast %cst : f32 to vector<1x128xf32>
    %cst_6 = arith.constant 0.000000e+00 : f32
    %8 = vector.broadcast %cst_6 : f32 to vector<1x128xf32>
    %c0_7 = arith.constant 0 : index
    %c0_8 = arith.constant 0 : index
    %c0_9 = arith.constant 0 : index
    %9 = vector.load %arg1[%c0_7, %c0_8, %c0_9] : memref<1x16x64xbf16, #tpu.memory_space<vmem>>, vector<1x16x64xbf16>
    %10 = vector.shape_cast %9 : vector<1x16x64xbf16> to vector<16x64xbf16>
    %cst_10 = arith.constant dense<0.000000e+00> : vector<16x128xf32>
    %11 = tpu.matmul %10, %3, %cst_10 {dimension_numbers = #tpu.dot_dimension_numbers<[1], [0], [0], [1], [0, 0, 1, 1], [], []>} : vector<16x64xbf16>, vector<64x128xbf16>, vector<16x128xf32> -> vector<16x128xf32>
    %cst_11 = arith.constant dense<0.000000e+00> : vector<16x128xf32>
    %12 = tpu.matmul %10, %1, %cst_11 {dimension_numbers = #tpu.dot_dimension_numbers<[1], [0], [0], [1], [0, 0, 1, 1], [], []>} : vector<16x64xbf16>, vector<64x128xbf16>, vector<16x128xf32> -> vector<16x128xf32>
    %cst_12 = arith.constant dense<0.000000e+00> : vector<16x128xf32>
    %13 = tpu.matmul %10, %5, %cst_12 {dimension_numbers = #tpu.dot_dimension_numbers<[1], [0], [0], [1], [0, 0, 1, 1], [], []>} : vector<16x64xbf16>, vector<64x128xbf16>, vector<16x128xf32> -> vector<16x128xf32>
    %c0_i32 = arith.constant 0 : i32
    %14 = vector.broadcast %c0_i32 : i32 to vector<16x1xi32>
    %15 = arith.cmpi sgt, %6, %14 : vector<16x1xi32>
    %c1_i32 = arith.constant 1 : i32
    %16 = tpu.dynamic_rotate %12 by %c1_i32 dim 0 : vector<16x128xf32>, i32 -> vector<16x128xf32>
    %cst_13 = arith.constant 0.000000e+00 : f32
    %17 = vector.shape_cast %15 : vector<16x1xi1> to vector<16x1xi1>
    %18 = vector.broadcast %17 : vector<16x1xi1> to vector<16x128xi1>
    %19 = vector.broadcast %cst_13 : f32 to vector<16x128xf32>
    %20 = arith.select %18, %16, %19 : vector<16x128xi1>, vector<16x128xf32>
    %21 = arith.addf %11, %20 : vector<16x128xf32>
    %c15_i32 = arith.constant 15 : i32
    %22 = vector.broadcast %c15_i32 : i32 to vector<16x1xi32>
    %23 = arith.cmpi slt, %6, %22 : vector<16x1xi32>
    %c15_i32_14 = arith.constant 15 : i32
    %24 = tpu.dynamic_rotate %13 by %c15_i32_14 dim 0 : vector<16x128xf32>, i32 -> vector<16x128xf32>
    %cst_15 = arith.constant 0.000000e+00 : f32
    %25 = vector.shape_cast %23 : vector<16x1xi1> to vector<16x1xi1>
    %26 = vector.broadcast %25 : vector<16x1xi1> to vector<16x128xi1>
    %27 = vector.broadcast %cst_15 : f32 to vector<16x128xf32>
    %28 = arith.select %26, %24, %27 : vector<16x128xi1>, vector<16x128xf32>
    %29 = arith.addf %21, %28 : vector<16x128xf32>
    %30 = arith.truncf %29 : vector<16x128xf32> to vector<16x128xbf16>
    %c0_16 = arith.constant 0 : index
    %c0_17 = arith.constant 0 : index
    %c0_18 = arith.constant 0 : index
    %31 = vector.load %arg3[%c0_16, %c0_17, %c0_18] : memref<1x16x128xbf16, #tpu.memory_space<vmem>>, vector<1x16x128xbf16>
    %32 = vector.shape_cast %31 : vector<1x16x128xbf16> to vector<16x128xbf16>
    %33 = vector.shape_cast %30 : vector<16x128xbf16> to vector<1x16x128xbf16>
    tpu.vector_store %arg3[%c0_16, %c0_17, %c0_18], %33 {strides = array<i32>} : memref<1x16x128xbf16, #tpu.memory_space<vmem>>, vector<1x16x128xbf16>,
    %cst_19 = arith.constant dense<0.000000e+00> : vector<128xf32>
    %34 = vector.multi_reduction <add>, %29, %cst_19 [0] : vector<16x128xf32> to vector<128xf32>
    %35 = vector.shape_cast %34 : vector<128xf32> to vector<1x128xf32>
    %36 = arith.addf %7, %35 : vector<1x128xf32>
    %37 = arith.mulf %29, %29 : vector<16x128xf32>
    %cst_20 = arith.constant dense<0.000000e+00> : vector<128xf32>
    %38 = vector.multi_reduction <add>, %37, %cst_20 [0] : vector<16x128xf32> to vector<128xf32>
    %39 = vector.shape_cast %38 : vector<128xf32> to vector<1x128xf32>
    %40 = arith.addf %8, %39 : vector<1x128xf32>
    %41 = tpu.concatenate %36, %40 in 0 : vector<1x128xf32>, vector<1x128xf32> -> vector<2x128xf32>
    %c0_21 = arith.constant 0 : index
    %c0_22 = arith.constant 0 : index
    %c0_23 = arith.constant 0 : index
    %42 = vector.load %arg4[%c0_21, %c0_22, %c0_23] : memref<1x2x128xf32, #tpu.memory_space<vmem>>, vector<1x2x128xf32>
    %43 = vector.shape_cast %42 : vector<1x2x128xf32> to vector<2x128xf32>
    %44 = vector.shape_cast %41 : vector<2x128xf32> to vector<1x2x128xf32>
    tpu.vector_store %arg4[%c0_21, %c0_22, %c0_23], %44 {strides = array<i32>} : memref<1x2x128xf32, #tpu.memory_space<vmem>>, vector<1x2x128xf32>,
    return
  }
  func.func @transform_0(%arg0: i32) -> (i32, i32, i32) {
    %c0_i32 = arith.constant 0 : i32
    %c0_i32_0 = arith.constant 0 : i32
    %c0_i32_1 = arith.constant 0 : i32
    return %arg0, %c0_i32, %c0_i32_0 : i32, i32, i32
  }
  func.func @transform_1(%arg0: i32) -> (i32, i32, i32) {
    %c0_i32 = arith.constant 0 : i32
    %c0_i32_0 = arith.constant 0 : i32
    %c0_i32_1 = arith.constant 0 : i32
    %c0_i32_2 = arith.constant 0 : i32
    return %c0_i32, %c0_i32_0, %c0_i32_1 : i32, i32, i32
  }
  func.func @transform_2(%arg0: i32) -> (i32, i32, i32) {
    %c0_i32 = arith.constant 0 : i32
    %c0_i32_0 = arith.constant 0 : i32
    %c0_i32_1 = arith.constant 0 : i32
    return %arg0, %c0_i32, %c0_i32_0 : i32, i32, i32
  }
  func.func @transform_3(%arg0: i32) -> (i32, i32, i32) {
    %c0_i32 = arith.constant 0 : i32
    %c0_i32_0 = arith.constant 0 : i32
    %c0_i32_1 = arith.constant 0 : i32
    return %arg0, %c0_i32, %c0_i32_0 : i32, i32, i32
  }
}

module attributes {stable_mosaic.version = 11 : i64} {
  func.func @norm_lrelu_kernel(%arg0: i32, %arg1: memref<16x128xbf16, #tpu.memory_space<vmem>>, %arg2: memref<1x128xf32, #tpu.memory_space<vmem>>, %arg3: memref<1x128xf32, #tpu.memory_space<vmem>>, %arg4: memref<16x128xf32, #tpu.memory_space<vmem>>) attributes {dimension_semantics = [#tpu.dimension_semantics<parallel>], iteration_bounds = array<i64: 2>, scalar_prefetch = 0 : i64, scratch_operands = 0 : i64, tpu.core_type = #tpu.core_type<tc>, window_params = [{transform_indices = @transform_0, window_bounds = array<i64: 16, 128>}, {pipeline_mode = #tpu.pipeline_mode<synchronous>, transform_indices = @transform_1, window_bounds = array<i64: 1, 128>}, {pipeline_mode = #tpu.pipeline_mode<synchronous>, transform_indices = @transform_2, window_bounds = array<i64: 1, 128>}, {transform_indices = @transform_3, window_bounds = array<i64: 16, 128>}]} {
    %c0 = arith.constant 0 : index
    %c0_0 = arith.constant 0 : index
    %0 = vector.load %arg1[%c0, %c0_0] : memref<16x128xbf16, #tpu.memory_space<vmem>>, vector<16x128xbf16>
    %1 = arith.extf %0 : vector<16x128xbf16> to vector<16x128xf32>
    %c0_1 = arith.constant 0 : index
    %c0_2 = arith.constant 0 : index
    %2 = vector.load %arg2[%c0_1, %c0_2] : memref<1x128xf32, #tpu.memory_space<vmem>>, vector<1x128xf32>
    %3 = vector.broadcast %2 : vector<1x128xf32> to vector<16x128xf32>
    %4 = arith.mulf %1, %3 : vector<16x128xf32>
    %c0_3 = arith.constant 0 : index
    %c0_4 = arith.constant 0 : index
    %5 = vector.load %arg3[%c0_3, %c0_4] : memref<1x128xf32, #tpu.memory_space<vmem>>, vector<1x128xf32>
    %6 = vector.broadcast %5 : vector<1x128xf32> to vector<16x128xf32>
    %7 = arith.addf %4, %6 : vector<16x128xf32>
    %cst = arith.constant 0.00999999977 : f32
    %8 = vector.broadcast %cst : f32 to vector<16x128xf32>
    %9 = arith.mulf %8, %7 : vector<16x128xf32>
    %10 = arith.maximumf %7, %9 : vector<16x128xf32>
    %c0_5 = arith.constant 0 : index
    %c0_6 = arith.constant 0 : index
    %11 = vector.load %arg4[%c0_5, %c0_6] : memref<16x128xf32, #tpu.memory_space<vmem>>, vector<16x128xf32>
    tpu.vector_store %arg4[%c0_5, %c0_6], %10 {strides = array<i32>} : memref<16x128xf32, #tpu.memory_space<vmem>>, vector<16x128xf32>,
    return
  }
  func.func @transform_0(%arg0: i32) -> (i32, i32) {
    %c0_i32 = arith.constant 0 : i32
    %c0_i32_0 = arith.constant 0 : i32
    return %arg0, %c0_i32 : i32, i32
  }
  func.func @transform_1(%arg0: i32) -> (i32, i32) {
    %c0_i32 = arith.constant 0 : i32
    %c0_i32_0 = arith.constant 0 : i32
    %c0_i32_1 = arith.constant 0 : i32
    return %c0_i32, %c0_i32_0 : i32, i32
  }
  func.func @transform_2(%arg0: i32) -> (i32, i32) {
    %c0_i32 = arith.constant 0 : i32
    %c0_i32_0 = arith.constant 0 : i32
    %c0_i32_1 = arith.constant 0 : i32
    return %c0_i32, %c0_i32_0 : i32, i32
  }
  func.func @transform_3(%arg0: i32) -> (i32, i32) {
    %c0_i32 = arith.constant 0 : i32
    %c0_i32_0 = arith.constant 0 : i32
    return %arg0, %c0_i32 : i32, i32
  }
}

</mosaic_0001>

<bundles_post_ra>
// kernel: tile.13
= control target key start
LH: loop header
LB: loop body
LE: loop exit
PB: predicated region body
PF: predicated region fallthrough
CT: control target
= control target key end

     0   :  { %s28_s0 = inlined_call_operand.vmem [shape: f32[8], index: 0, kind: input, shape index: {}]   ;;  %s29_s1 = inlined_call_operand.vmem [shape: f32[16,8], index: 1, kind: output, shape index: {}]  }
   0x1   :  { %v4_v0 = vld [vmem:[%s28_s0] ss:$0 sm:$0xff] }
   0x2   :  { %5 = vst [vmem:[%s29_s1] sm:$0xff] %v4_v0  ;;  %8 = vst [vmem:[%s29_s1 + $0x8] sm:$0xff] %v4_v0 }

// kernel: tile.14
= control target key start
LH: loop header
LB: loop body
LE: loop exit
PB: predicated region body
PF: predicated region fallthrough
CT: control target
= control target key end

     0   :  { %s133_s10 = smov 120   ;;  %s134_s11 = smov 104   ;;  %vm3_vm0 = vcmask 64512   ;;  %vm9_vm1 = vcmask 1048512   ;;  %vm15_vm2 = vcmask 982912   ;;  %vm21_vm3 = vcmask 917312   ;;  %s209_s0 = inlined_call_operand.vmem [shape: f32[16,8], index: 0, kind: input, shape index: {}]   ;;  %s210_s1 = inlined_call_operand.vmem [shape: f32[1,128], index: 1, kind: output, shape index: {}]  }
   0x1   :  { %v103_v0 = vld [vmem:[%s209_s0 + $0xf] sm:$0x1]   ;;  %v105_v1 = vld [vmem:[%s209_s0 + $0xd] sm:$0x1]   ;;  %v104_v2 = vld [vmem:[%s209_s0 + $0xe] sm:$0x1]  }
   0x2   :  { %7 = vrot.lane.b32.xlu0 %v103_v0, %s133_s10  ;;  %19 = vrot.lane.b32.xlu1 %v105_v1, %s134_s11  ;;  %v106_v3 = vld [vmem:[%s209_s0 + $0xc] sm:$0x1]   ;;  %s135_s16 = smov 112   ;;  %s136_s17 = smov 96   ;;  %v107_v4 = vld [vmem:[%s209_s0 + $0xb] sm:$0x1]  }
   0x3   :  { %v108_v5 = vld [vmem:[%s209_s0 + $0xa] sm:$0x1]   ;;  %v2_v6 = vld [vmem:[%s209_s0] sm:$0x1]   ;;  %s137_s24 = smov 88   ;;  %s138_s25 = smov 80  }
   0x4   :  { %4 = vst.msk [vmem:[#allocation0] sm:$0x1] %vm3_vm0, %v2_v6   ;;  %v109_v7 = vld [vmem:[%s209_s0 + $0x9] sm:$0x1]   ;;  %v110_v8 = vld [vmem:[%s209_s0 + $0x8] sm:$0x1]  }
   0x5   :  { %s139_s30 = smov 72   ;;  %s140_s2 = smov 64   ;;  %v111_v9 = vld [vmem:[%s209_s0 + $0x7] sm:$0x1]   ;;  %v112_v10 = vld [vmem:[%s209_s0 + $0x6] sm:$0x1]  }
   0x6   :  { %13 = vrot.lane.b32.xlu0 %v104_v2, %s135_s16  ;;  %25 = vrot.lane.b32.xlu1 %v106_v3, %s136_s17  ;;  %s141_s7 = smov 56   ;;  %s142_s8 = smov 48   ;;  %v113_v11 = vld [vmem:[%s209_s0 + $0x5] sm:$0x1]   ;;  %v114_v12 = vld [vmem:[%s209_s0 + $0x4] sm:$0x1]  }
   0x7   :  { %s143_s13 = smov 40   ;;  %s144_s14 = smov 32   ;;  %v115_v13 = vld [vmem:[%s209_s0 + $0x3] sm:$0x1]   ;;  %v116_v14 = vld [vmem:[%s209_s0 + $0x2] sm:$0x1]  }
   0x8   :  { %s145_s19 = smov 24   ;;  %s146_s20 = smov 16   ;;  %v117_v15 = vld [vmem:[%s209_s0 + $0x1] sm:$0x1]   ;;  %vm27_vm4 = vcmask 851712   ;;  %vm33_vm5 = vcmask 786112  }
   0x9   :  { %s147_s0 = smov 8   ;;  %vm39_vm6 = vcmask 720512   ;;  %vm45_vm7 = vcmask 654912   ;;  %vm51_vm8 = vcmask 589312   ;;  %vm57_vm9 = vcmask 523712  }
   0xa   :  { %31 = vrot.lane.b32.xlu0 %v107_v4, %s137_s24  ;;  %37 = vrot.lane.b32.xlu1 %v108_v5, %s138_s25  ;;  %vm63_vm10 = vcmask 458112   ;;  %vm69_vm11 = vcmask 392512   ;;  %vm75_vm12 = vcmask 326912   ;;  %vm81_vm13 = vcmask 261312  }
   0xb   :  { %vm87_vm14 = vcmask 195712   ;;  %vm93_vm15 = vcmask 130112  }
   0xe   :  { %43 = vrot.lane.b32.xlu0 %v109_v7, %s139_s30  ;;  %49 = vrot.lane.b32.xlu1 %v110_v8, %s140_s2 }
  0x12   :  { %55 = vrot.lane.b32.xlu0 %v111_v9, %s141_s7  ;;  %61 = vrot.lane.b32.xlu1 %v112_v10, %s142_s8 }
  0x16   :  { %67 = vrot.lane.b32.xlu0 %v113_v11, %s143_s13  ;;  %73 = vrot.lane.b32.xlu1 %v114_v12, %s144_s14 }
  0x1a   :  { %79 = vrot.lane.b32.xlu0 %v115_v13, %s145_s19  ;;  %85 = vrot.lane.b32.xlu1 %v116_v14, %s146_s20 }
  0x1e   :  { %91 = vrot.lane.b32.xlu0 %v117_v15, %s147_s0 }
  0x74   :  { %v8_v16 = vpop.permute.xlu0 %7   ;;  %v20_v17 = vpop.permute.xlu1 %19  }
  0x75   :  { %10 = vst.msk [vmem:[#allocation0] sm:$0x1] %vm9_vm1, %v8_v16  }
  0x78   :  { %v14_v18 = vpop.permute.xlu0 %13   ;;  %v26_v19 = vpop.permute.xlu1 %25  }
  0x79   :  { %16 = vst.msk [vmem:[#allocation0] sm:$0x1] %vm15_vm2, %v14_v18  }
  0x7a   :  { %22 = vst.msk [vmem:[#allocation0] sm:$0x1] %vm21_vm3, %v20_v17  }
  0x7b   :  { %28 = vst.msk [vmem:[#allocation0] sm:$0x1] %vm27_vm4, %v26_v19  }
  0x7c   :  { %v32_v20 = vpop.permute.xlu0 %31   ;;  %v38_v21 = vpop.permute.xlu1 %37  }
  0x7d   :  { %34 = vst.msk [vmem:[#allocation0] sm:$0x1] %vm33_vm5, %v32_v20  }
  0x7e   :  { %40 = vst.msk [vmem:[#allocation0] sm:$0x1] %vm39_vm6, %v38_v21  }
  0x80   :  { %v44_v22 = vpop.permute.xlu0 %43   ;;  %v50_v23 = vpop.permute.xlu1 %49  }
  0x81   :  { %46 = vst.msk [vmem:[#allocation0] sm:$0x1] %vm45_vm7, %v44_v22  }
  0x82   :  { %52 = vst.msk [vmem:[#allocation0] sm:$0x1] %vm51_vm8, %v50_v23  }
  0x84   :  { %v56_v24 = vpop.permute.xlu0 %55   ;;  %v62_v25 = vpop.permute.xlu1 %61  }
  0x85   :  { %58 = vst.msk [vmem:[#allocation0] sm:$0x1] %vm57_vm9, %v56_v24  }
  0x86   :  { %64 = vst.msk [vmem:[#allocation0] sm:$0x1] %vm63_vm10, %v62_v25  }
  0x88   :  { %v68_v26 = vpop.permute.xlu0 %67   ;;  %v74_v27 = vpop.permute.xlu1 %73  }
  0x89   :  { %70 = vst.msk [vmem:[#allocation0] sm:$0x1] %vm69_vm11, %v68_v26  }
  0x8a   :  { %76 = vst.msk [vmem:[#allocation0] sm:$0x1] %vm75_vm12, %v74_v27  }
  0x8c   :  { %v80_v28 = vpop.permute.xlu0 %79   ;;  %v86_v29 = vpop.permute.xlu1 %85  }
  0x8d   :  { %82 = vst.msk [vmem:[#allocation0] sm:$0x1] %vm81_vm13, %v80_v28  }
  0x8e   :  { %88 = vst.msk [vmem:[#allocation0] sm:$0x1] %vm87_vm14, %v86_v29  }
  0x90   :  { %v92_v30 = vpop.permute.xlu0 %91  }
  0x91   :  { %94 = vst.msk [vmem:[#allocation0] sm:$0x1] %vm93_vm15, %v92_v30  }
  0x98   :  { %v99_v31 = vld [vmem:[#allocation0] sm:$0x1] }
  0x99   :  { %102 = vst [vmem:[%s210_s1] sm:$0x1] %v99_v31 }

// kernel: conv_block_forward.3
= control target key start
LH: loop header
LB: loop body
LE: loop exit
PB: predicated region body
PF: predicated region fallthrough
CT: control target
= control target key end

     0   :  { %s311_s12 = smov 0   ;;  %s334_s0 = inlined_call_operand.vmem [shape: bf16[32,128], index: 0, kind: input, shape index: {}]   ;;  %s335_s1 = inlined_call_operand.vmem [shape: f32[1,128], index: 1, kind: input, shape index: {}]   ;;  %s336_s2 = inlined_call_operand.vmem [shape: f32[1,128], index: 2, kind: input, shape index: {}]   ;;  %s337_s3 = inlined_call_operand.vmem [shape: f32[32,128], index: 3, kind: output, shape index: {}]  }
   0x1 LB: > { %s258_s13 = sadd.s32 4294967295, %s289_s12   ;;  %p262_p0 = scmp.ge.s32.totalorder %s289_s12, 1  ;;  %s289_s12 = sphi %s311_s12, %s13_s12  }
   0x2   : > { %p138_p1 = scmp.lt.s32.totalorder %s289_s12, 3 }
   0x4   : > { %p139_p2 = pnand %p262_p0, %p138_p1 }
   0x5   : > { %s263_s14 = sshll.u32 (!%p139_p2), %s258_s13, 1 }
   0x6   : > { %142 = sbr.rel (%p139_p2) target bundleno = 26 (0x1a), region = 32  ;;  %p163_p3 = scmp.lt.s32.totalorder (!%p139_p2), %s263_s14, 3 }
   0xb   : > { %s339_s14 = smov (!%p163_p3, %s263_s14), 3  ;;  %v267_v1 = vld [vmem:[%s335_s1] ss:$0 sm:$0xff] }
   0xc   : > { %s264_s15 = sshll.u32 %s339_s14, 2  ;;  %v268_v4 = vld [vmem:[%s336_s2] ss:$0 sm:$0xff]  ;;  %s266_s23 = sshll.u32 %s339_s14, 3 }
   0xd   : > { %s166_s18 = scalar_lea.vmem %s334_s0, %s264_s15  ;;  %s172_s26 = scalar_lea.vmem %s337_s3, %s266_s23 }
   0xe   : > { %v272_v0 = vld [vmem:[%s166_s18] sm:$0xff]  }
   0xf   : > { %v273_v2 = vunpack.c.l.bf16 %v272_v0  ;;  %v274_v3 = vunpack.c.h.bf16 %v272_v0 }
  0x11   : > { %v185_v5 = vmul.f32 %v273_v2, %v267_v1  ;;  %v186_v6 = vmul.f32 %v274_v3, %v267_v1 }
  0x13   : > { %v194_v7 = vadd.f32 %v268_v4, %v185_v5  ;;  %v195_v8 = vadd.f32 %v268_v4, %v186_v6 }
  0x15   : > { %v196_v9 = vmul.f32 0.01, %v194_v7  ;;  %v197_v10 = vmul.f32 0.01, %v195_v8 }
  0x17   : > { %v198_v11 = vmax.f32 %v194_v7, %v196_v9  ;;  %v199_v12 = vmax.f32 %v195_v8, %v197_v10 }
  0x19   : > { %200 = vst [vmem:[%s172_s26] sm:$0xff] %v198_v11  ;;  %201 = vst [vmem:[%s172_s26 + $0x8] sm:$0xff] %v199_v12 }
  0x1a PF: > { %s13_s12 = sadd.s32 1, %s289_s12  }
  0x1b   : > { %p10_p4 = scmp.ge.s32.totalorder %s13_s12, 4  }
  0x1d   :  { %12 = sbr.rel (!%p10_p4) target bundleno = 1 (0x1), region = 62 }

// kernel: conv_block_forward.2
= control target key start
LH: loop header
LB: loop body
LE: loop exit
PB: predicated region body
PF: predicated region fallthrough
CT: control target
= control target key end

     0   :  { %s722_s12 = smov 0   ;;  %s792_s0 = inlined_call_operand.vmem [shape: bf16[2,16,64], index: 0, kind: input, shape index: {}]   ;;  %s793_s1 = inlined_call_operand.vmem [shape: bf16[3,64,128], index: 1, kind: input, shape index: {}]   ;;  %s794_s2 = inlined_call_operand.vmem [shape: bf16[2,16,128], index: 2, kind: output, shape index: {0}]   ;;  %s795_s3 = inlined_call_operand.vmem [shape: f32[2,2,128], index: 3, kind: output, shape index: {1}]  }
   0x1 LB: > { %s563_s13 = sadd.s32 4294967295, %s698_s12   ;;  %p567_p0 = scmp.ge.s32.totalorder %s698_s12, 1  ;;  %s698_s12 = sphi %s722_s12, %s14_s12  }
   0x2   : > { %p140_p1 = scmp.lt.s32.totalorder %s698_s12, 3 }
   0x4   : > { %p141_p2 = pnand %p567_p0, %p140_p1 }
   0x5   : > { %p168_p3 = scmp.lt.s32.totalorder (!%p141_p2), %s563_s13, 1 }
   0x6   : > { %144 = sbr.rel (%p141_p2) target bundleno = 263 (0x107), region = 28 }
   0xb   : > { %v679_v0 = vld [vmem:[%s793_s1 + $0x18] sm:$0xff]   ;;  %v700_v1 = vmov 0.0   ;;  %v680_v2 = vld [vmem:[%s793_s1 + $0x10] sm:$0xff]   ;;  %vm701_vm0 = vmmov 0   ;;  %s797_s13 = smov (!%p168_p3, %s563_s13), 1  ;;  %v681_v5 = vld [vmem:[%s793_s1 + $0x8] sm:$0xff]   ;;  %v209_v16 = vlaneseq }
   0xc   : > { %633 = vmatprep.subr.bf16.mxu0 %v700_v1  ;;  %645 = vmatprep.subr.bf16.mxu1 %v700_v1  ;;  %v682_v3 = vld [vmem:[%s793_s1 + $0x58] sm:$0xff]   ;;  %v684_v4 = vld [vmem:[%s793_s1 + $0x50] sm:$0xff]   ;;  %s609_s24 = sshll.u32 %s797_s13, 3  ;;  %v686_v6 = vld [vmem:[%s793_s1 + $0x48] sm:$0xff]   ;;  %vm243_vm1 = vcmask 523264   ;;  %s572_s20 = sshll.u32 %s797_s13, 1 }
   0xd   : > { %634 = vmatpush3.bf16.msra.mxu0 %v679_v0  ;;  %641 = vmatprep.mubr.msk.bf16.mxu0 %vm701_vm0, %v700_v1  ;;  %s172_s27 = scalar_lea.vmem %s792_s0, %s609_s24  ;;  %v683_v7 = vld [vmem:[%s793_s1] sm:$0xff]   ;;  %v687_v10 = vld [vmem:[%s793_s1 + $0x38] sm:$0xff]   ;;  %v689_v11 = vld [vmem:[%s793_s1 + $0x30] sm:$0xff]   ;;  %v210_v21 = vshrl.u32 %v209_v16, 7  ;;  %s177_s19 = scalar_lea.vmem %s794_s2, %s609_s24  ;;  %vm474_vm6 = vcmask 1040384  }
   0xe   : > { %635 = vmatprep.subr.bf16.mxu0 %v700_v1  ;;  %653 = vmatprep.mubr.msk.bf16.mxu1 %vm701_vm0, %v700_v1  ;;  %v685_v8 = vld [vmem:[%s172_s27] sm:$0xff]   ;;  %v690_v12 = vld [vmem:[%s793_s1 + $0x28] sm:$0xff]   ;;  %s181_s23 = scalar_lea.vmem %s795_s3, %s572_s20 }
   0xf   : > { %646 = vmatpush3.bf16.msra.mxu1 %v682_v3  ;;  %v688_v9 = vld [vmem:[%s793_s1 + $0x40] sm:$0xff]   ;;  %vm357_vm2 = vcmp.lt.s32.totalorder %v210_v21, 1  ;;  %vm353_vm3 = vcmp.gt.s32.totalorder %v210_v21, 0  ;;  %vm435_vm4 = vcmp.lt.s32.totalorder %v210_v21, 7  ;;  %v211_v29 = vadd.s32 8, %v210_v21 }
  0x10   : > { %647 = vmatprep.subr.bf16.mxu1 %v700_v1  ;;  %v691_v13 = vld [vmem:[%s793_s1 + $0x20] sm:$0xff]  }
  0x11   : > { %636 = vmatpush3.bf16.msra.mxu0 %v680_v2  ;;  %vm432_vm5 = vcmp.lt.s32.totalorder %v211_v29, 15 }
  0x12   : > { %637 = vmatprep.subr.bf16.mxu0 %v700_v1 }
  0x13   : > { %648 = vmatpush3.bf16.msra.mxu1 %v684_v4 }
  0x14   : > { %649 = vmatprep.subr.bf16.mxu1 %v700_v1 }
  0x15   : > { %638 = vmatpush3.bf16.msra.mxu0 %v681_v5 }
  0x16   : > { %639 = vmatprep.subr.bf16.mxu0 %v700_v1 }
  0x17   : > { %650 = vmatpush3.bf16.msra.mxu1 %v686_v6 }
  0x18   : > { %651 = vmatprep.subr.bf16.mxu1 %v700_v1 }
  0x19   : > { %640 = vmatpush3.bf16.msra.mxu0 %v683_v7 }
  0x1a   : > { %657 = vmatprep.subr.bf16.mxu0 %v700_v1 }
  0x1b   : > { %652 = vmatpush3.bf16.msra.mxu1 %v688_v9 }
  0x1c   : > { %642 = vmatmul.mubr.msk.bf16.vlgmr.msra.gmra.mxu0 %vm243_vm1, %v685_v8 }
  0x1d   : > { %658 = vmatpush3.bf16.msra.mxu0 %v687_v10  ;;  %665 = vmatprep.mubr.msk.bf16.mxu0 %vm701_vm0, %v700_v1 }
  0x1e   : > { %659 = vmatprep.subr.bf16.mxu0 %v700_v1  ;;  %654 = vmatmul.mubr.msk.bf16.vlgmr.msra.gmra.mxu1 %vm243_vm1, %v685_v8 }
  0x21   : > { %660 = vmatpush3.bf16.msra.mxu0 %v689_v11 }
  0x22   : > { %661 = vmatprep.subr.bf16.mxu0 %v700_v1 }
  0x25   : > { %662 = vmatpush3.bf16.msra.mxu0 %v690_v12 }
  0x26   : > { %663 = vmatprep.subr.bf16.mxu0 %v700_v1 }
  0x29   : > { %664 = vmatpush3.bf16.msra.mxu0 %v691_v13 }
  0x2c   : > { %666 = vmatmul.mubr.msk.bf16.vlgmr.msra.gmra.mxu0 %vm243_vm1, %v685_v8 }
  0xdc   : > { %v281_v14 = vpop.f32.mrf.mxu0 }
  0xdd   : > { %v355_v25 = vrot.slane %v281_v14, 7 }
  0xde   : > { %v643_v15 = vpop.f32.mrf.mxu0  ;;  %v346_v17 = vpop.f32.mrf.mxu1 }
  0xdf   : > { %v433_v27 = vrot.slane %v346_v17, 1 }
  0xe0   : > { %v284_v18 = vpop.f32.mrf.mxu0  ;;  %v655_v19 = vpop.f32.mrf.mxu1 }
  0xe1   : > { %v356_v23 = vrot.slane %v284_v18, 7 }
  0xe2   : > { %v644_v20 = vpop.f32.mrf.mxu0  ;;  %v349_v22 = vpop.f32.mrf.mxu1 }
  0xe3   : > { %v359_v26 = vsel %vm357_vm2, %v356_v23, %v355_v25  ;;  %v434_v28 = vrot.slane %v349_v22, 1  ;;  %v358_v36 = vsel %vm357_vm2, %v355_v25, %v356_v23 }
  0xe4   : > { %v656_v24 = vpop.f32.mrf.mxu1  ;;  %v364_v30 = vsel %vm353_vm3, %v359_v26, 0.0 }
  0xe5   : > { %v436_v33 = vsel %vm435_vm4, %v433_v27, %v434_v28  ;;  %v437_v35 = vsel %vm435_vm4, %v434_v28, %v433_v27 }
  0xe6   : > { %v443_v40 = vsel %vm432_vm5, %v437_v35, 0.0 }
  0xec   : > { %v424_v31 = vpop.f32.mrf.mxu0 }
  0xed   : > { %v425_v32 = vadd.f32 %v424_v31, %v364_v30 }
  0xee   : > { %v667_v34 = vpop.f32.mrf.mxu0 }
  0xef   : > { %v444_v38 = vadd.f32 %v436_v33, %v425_v32 }
  0xf0   : > { %v427_v37 = vpop.f32.mrf.mxu0 }
  0xf1   : > { %v428_v39 = vadd.f32 %v427_v37, %v358_v36  ;;  %v464_v43 = vmul.f32 %v444_v38, %v444_v38 }
  0xf2   : > { %v668_v41 = vpop.f32.mrf.mxu0 }
  0xf3   : > { %v445_v42 = vadd.f32 %v443_v40, %v428_v39 }
  0xf5   : > { %v616_v44 = vpack.c.bf16 %v445_v42, %v444_v38  ;;  %v456_v45 = vadd.f32 %v445_v42, %v444_v38  ;;  %v465_v46 = vmul.f32 %v445_v42, %v445_v42 }
  0xf7   : > { %617 = vst [vmem:[%s177_s19] sm:$0xff] %v616_v44   ;;  %v457_v47 = vrot.slane %v456_v45, 4  ;;  %v466_v48 = vadd.f32 %v465_v46, %v464_v43 }
  0xf9   : > { %v458_v49 = vadd.f32 %v457_v47, %v456_v45  ;;  %v467_v50 = vrot.slane %v466_v48, 4 }
  0xfb   : > { %v459_v51 = vrot.slane %v458_v49, 2  ;;  %v468_v52 = vadd.f32 %v467_v50, %v466_v48 }
  0xfd   : > { %v460_v53 = vadd.f32 %v459_v51, %v458_v49  ;;  %v469_v54 = vrot.slane %v468_v52, 2 }
  0xff   : > { %v461_v55 = vrot.slane %v460_v53, 1  ;;  %v470_v56 = vadd.f32 %v469_v54, %v468_v52 }
 0x101   : > { %v471_v57 = vrot.slane %v470_v56, 1  ;;  %v462_v58 = vadd.f32 %v461_v55, %v460_v53 }
 0x103   : > { %v472_v59 = vadd.f32 %v471_v57, %v470_v56 }
 0x105   : > { %v475_v60 = vsel %vm474_vm6, %v462_v58, %v472_v59 }
 0x106   : > { %476 = vst [vmem:[%s181_s23] sm:$0x3] %v475_v60 }
 0x107 PF: > { %s14_s12 = sadd.s32 1, %s698_s12  }
 0x108   : > { %p11_p4 = scmp.ge.s32.totalorder %s14_s12, 4  }
 0x10a   :  { %13 = sbr.rel (!%p11_p4) target bundleno = 1 (0x1), region = 72 }

</bundles_post_ra>
